<compile_context>
chip_gen: v5e
topology: v5e:2x2
jax: 0.10.0
libtpu: 0.0.40
codegen_flags: <defaults>
</compile_context>

<pallas_src>
import functools

import jax
import jax.numpy as jnp
import numpy as np
from jax.experimental import pallas as pl
from jax.experimental.pallas import tpu as pltpu

EPS = 1e-5                       # nn.BatchNorm2d default eps
TM_CAP = 512                     # M-tile cap (rows); multiple of 8
VMEM_LIMIT = 48 * 1024 * 1024    # <= v7x 64 MiB physical; safe on v5e/v6e too


def _round_up(x, m):
    return ((x + m - 1) // m) * m


def _pick_tm(m, max_c):
    """Largest M-tile s.t. ~6 live (tm, c128) f32 buffers fit a 24 MiB budget."""
    c128 = _round_up(max(max_c, 1), 128)
    budget_rows = (24 * 1024 * 1024) // (6 * c128 * 4)
    budget_rows = max(8, (budget_rows // 8) * 8)
    return min(_round_up(max(m, 8), 8), TM_CAP, budget_rows)


def _mosaic(sem):
    return pltpu.CompilerParams(dimension_semantics=sem,
                                vmem_limit_bytes=VMEM_LIMIT)


def _bn_scale_shift(s1, sq, gamma, beta, count):
    """Precompute BN scale/shift once in plain JAX (tiny (1, C) vectors)."""
    mean = s1 / count
    var = sq / count - mean * mean   # TODO(synk): one-pass var, see header note
    scale = gamma.reshape(1, -1) * jax.lax.rsqrt(var + EPS)
    shift = beta.reshape(1, -1) - mean * scale
    return scale, shift


# ----------------- stage A phase 1: fused [w1 | w_sc] matmul + stats -----------------

def _mm_stats_split_kernel(x_ref, w_ref, z1_ref, zsc_ref, sum_ref, sq_ref, *, f1):
    i = pl.program_id(0)
    z = jnp.dot(x_ref[...], w_ref[...], preferred_element_type=jnp.float32)
    z1_ref[...] = z[:, :f1]
    zsc_ref[...] = z[:, f1:]

    @pl.when(i == 0)
    def _init():
        sum_ref[...] = jnp.zeros_like(sum_ref)
        sq_ref[...] = jnp.zeros_like(sq_ref)

    sum_ref[...] += jnp.sum(z, axis=0, keepdims=True)
    sq_ref[...] += jnp.sum(z * z, axis=0, keepdims=True)


def matmul_stats_split(x2d, w2d, f1, *, tm):
    m, k = x2d.shape
    c = w2d.shape[1]
    f3 = c - f1
    mp = _round_up(m, tm)
    if mp != m:
        x2d = jnp.pad(x2d, ((0, mp - m), (0, 0)))   # zero rows -> zero stats bias
    grid = (mp // tm,)
    kernel = functools.partial(_mm_stats_split_kernel, f1=f1)
    return pl.pallas_call(
        kernel,
        grid_spec=pltpu.PrefetchScalarGridSpec(
            num_scalar_prefetch=0, grid=grid,
            in_specs=[pl.BlockSpec((tm, k), lambda i: (i, 0)),
                      pl.BlockSpec((k, c), lambda i: (0, 0))],
            out_specs=[pl.BlockSpec((tm, f1), lambda i: (i, 0)),
                       pl.BlockSpec((tm, f3), lambda i: (i, 0)),
                       pl.BlockSpec((1, c), lambda i: (0, 0)),
                       pl.BlockSpec((1, c), lambda i: (0, 0))]),
        out_shape=(jax.ShapeDtypeStruct((mp, f1), jnp.float32),
                   jax.ShapeDtypeStruct((mp, f3), jnp.float32),
                   jax.ShapeDtypeStruct((1, c), jnp.float32),
                   jax.ShapeDtypeStruct((1, c), jnp.float32)),
        compiler_params=_mosaic(("arbitrary",)),
    )(x2d, w2d)


# ----------------- stage A phase 2: BN apply + ReLU (main path only) -----------------

def _scale_shift_relu_kernel(z_ref, sc_ref, sh_ref, o_ref):
    o_ref[...] = jnp.maximum(z_ref[...] * sc_ref[...] + sh_ref[...], 0.0)


def scale_shift_relu(z, scale, shift, *, tm):
    mp, c = z.shape
    grid = (mp // tm,)
    return pl.pallas_call(
        _scale_shift_relu_kernel,
        grid_spec=pltpu.PrefetchScalarGridSpec(
            num_scalar_prefetch=0, grid=grid,
            in_specs=[pl.BlockSpec((tm, c), lambda i: (i, 0)),
                      pl.BlockSpec((1, c), lambda i: (0, 0)),
                      pl.BlockSpec((1, c), lambda i: (0, 0))],
            out_specs=pl.BlockSpec((tm, c), lambda i: (i, 0))),
        out_shape=jax.ShapeDtypeStruct((mp, c), jnp.float32),
        compiler_params=_mosaic(("parallel",)),
    )(z, scale, shift)


# ----------------- stage B phase 1: fxf conv (streamed halo windows) + stats ---------

def _conv_fxf_stats_kernel(xp_hbm, w_ref, mask_ref, z_ref, sum_ref, sq_ref,
                           buf, sem, *, taps, tm, window):
    i = pl.program_id(0)
    nsteps = pl.num_programs(0)

    def start_in(step, slot):
        pltpu.make_async_copy(xp_hbm.at[pl.ds(step * tm, window), :],
                              buf.at[slot], sem.at[slot]).start()

    def wait_in(slot):
        pltpu.make_async_copy(xp_hbm.at[pl.ds(0, window), :],
                              buf.at[slot], sem.at[slot]).wait()

    @pl.when(i == 0)
    def _prologue():
        start_in(0, 0)                        # prime slot 0
        sum_ref[...] = jnp.zeros_like(sum_ref)
        sq_ref[...] = jnp.zeros_like(sq_ref)

    slot = jax.lax.rem(i, 2)
    wait_in(slot)

    @pl.when(i + 1 < nsteps)
    def _prefetch():
        start_in(i + 1, 1 - slot)             # overlap next window with compute

    cur = buf.at[slot]
    # f*f shifted-window matmuls; ref-level loads at static offsets, accumulate
    # into the VMEM-resident output tile (keeps vreg pressure low).
    z_ref[...] = jnp.dot(cur[pl.ds(taps[0], tm), :], w_ref[0],
                         preferred_element_type=jnp.float32)
    for t in range(1, len(taps)):
        z_ref[...] += jnp.dot(cur[pl.ds(taps[t], tm), :], w_ref[t],
                              preferred_element_type=jnp.float32)

    z = z_ref[...]
    zm = z * mask_ref[...]                    # mask out halo / non-valid rows
    sum_ref[...] += jnp.sum(zm, axis=0, keepdims=True)
    sq_ref[...] += jnp.sum(zm * z, axis=0, keepdims=True)


def conv_fxf_stats(y_nhwc, w_oihw, f, *, tm):
    """fxf conv (stride 1, pad 1) as f*f shifted-window matmuls + BN stats."""
    n, hs, ws, c1 = y_nhwc.shape
    f2 = w_oihw.shape[0]
    pad = 1
    hp, wp = hs + 2 * pad, ws + 2 * pad
    ho, wo = hp - f + 1, wp - f + 1
    xp = jnp.pad(y_nhwc, ((0, 0), (pad, pad), (pad, pad), (0, 0)))
    xp2 = xp.reshape(n * hp * wp, c1)                      # single ~1x copy (no f*f)

    max_off = (f - 1) * wp + (f - 1)
    r_out = n * hp * wp - max_off                          # padded-coord output rows
    r_out_pad = _round_up(r_out, tm)
    window = tm + _round_up(max_off, 8)
    r_in_pad = (r_out_pad // tm - 1) * tm + window
    xp2 = jnp.pad(xp2, ((0, r_in_pad - n * hp * wp), (0, 0)))

    # weights: (F2, C1, f, f) -> (f*f, C1, F2); tap t = ki*f + kj
    wt = jnp.transpose(w_oihw, (2, 3, 1, 0)).reshape(f * f, c1, f2)
    taps = tuple(ki * wp + kj for ki in range(f) for kj in range(f))

    # validity mask over padded-coordinate output rows
    r = jnp.arange(r_out_pad)
    hpi = (r // wp) % hp
    wpi = r % wp
    valid = (hpi < ho) & (wpi < wo) & (r < r_out)
    mask = valid.astype(jnp.float32).reshape(r_out_pad, 1)

    nsteps = r_out_pad // tm
    kernel = functools.partial(_conv_fxf_stats_kernel, taps=taps, tm=tm,
                               window=window)
    z, s1, sq = pl.pallas_call(
        kernel,
        grid_spec=pltpu.PrefetchScalarGridSpec(
            num_scalar_prefetch=0, grid=(nsteps,),
            in_specs=[pl.BlockSpec(memory_space=pl.ANY),    # streamed manually
                      pl.BlockSpec((f * f, c1, f2), lambda i: (0, 0, 0)),
                      pl.BlockSpec((tm, 1), lambda i: (i, 0))],
            out_specs=[pl.BlockSpec((tm, f2), lambda i: (i, 0)),
                       pl.BlockSpec((1, f2), lambda i: (0, 0)),
                       pl.BlockSpec((1, f2), lambda i: (0, 0))],
            scratch_shapes=[pltpu.VMEM((2, window, c1), jnp.float32),
                            pltpu.SemaphoreType.DMA((2,))]),
        out_shape=(jax.ShapeDtypeStruct((r_out_pad, f2), jnp.float32),
                   jax.ShapeDtypeStruct((1, f2), jnp.float32),
                   jax.ShapeDtypeStruct((1, f2), jnp.float32)),
        compiler_params=_mosaic(("arbitrary",)),
    )(xp2, wt, mask)

    # compact padded-coordinate rows to valid pixels (plain JAX, 1x copy of F2 cols)
    z_full = jnp.pad(z[:r_out], ((0, n * hp * wp - r_out), (0, 0)))
    z2d = z_full.reshape(n, hp, wp, f2)[:, :ho, :wo, :].reshape(n * ho * wo, f2)
    return z2d, s1, sq, n * ho * wo, (n, ho, wo)


# ----------------- fused: stage-B BN apply + ReLU + stage-C matmul + stats -----------

def _bn_mm_stats_kernel(z2_ref, sc2_ref, sh2_ref, w3_ref, z3_ref, sum_ref, sq_ref,
                        *, valid_rows, tm, mask_last):
    i = pl.program_id(0)
    y2 = jnp.maximum(z2_ref[...] * sc2_ref[...] + sh2_ref[...], 0.0)
    z3 = jnp.dot(y2, w3_ref[...], preferred_element_type=jnp.float32)
    z3_ref[...] = z3

    @pl.when(i == 0)
    def _init():
        sum_ref[...] = jnp.zeros_like(sum_ref)
        sq_ref[...] = jnp.zeros_like(sq_ref)

    if mask_last:
        last = pl.num_programs(0) - 1

        @pl.when(i != last)
        def _acc():
            sum_ref[...] += jnp.sum(z3, axis=0, keepdims=True)
            sq_ref[...] += jnp.sum(z3 * z3, axis=0, keepdims=True)

        @pl.when(i == last)                    # padding rows only on the last tile
        def _acc_masked():
            row = jax.lax.broadcasted_iota(jnp.int32, z3.shape, 0) + i * tm
            zm = jnp.where(row < valid_rows, z3, 0.0)
            sum_ref[...] += jnp.sum(zm, axis=0, keepdims=True)
            sq_ref[...] += jnp.sum(zm * z3, axis=0, keepdims=True)
    else:
        sum_ref[...] += jnp.sum(z3, axis=0, keepdims=True)
        sq_ref[...] += jnp.sum(z3 * z3, axis=0, keepdims=True)


def bn_relu_matmul_stats(z2, scale2, shift2, w3_2d, *, valid_rows, tm):
    mp, c2 = z2.shape
    c3 = w3_2d.shape[1]
    grid = (mp // tm,)
    kernel = functools.partial(_bn_mm_stats_kernel, valid_rows=valid_rows, tm=tm,
                               mask_last=(valid_rows % tm != 0))
    return pl.pallas_call(
        kernel,
        grid_spec=pltpu.PrefetchScalarGridSpec(
            num_scalar_prefetch=0, grid=grid,
            in_specs=[pl.BlockSpec((tm, c2), lambda i: (i, 0)),
                      pl.BlockSpec((1, c2), lambda i: (0, 0)),
                      pl.BlockSpec((1, c2), lambda i: (0, 0)),
                      pl.BlockSpec((c2, c3), lambda i: (0, 0))],
            out_specs=[pl.BlockSpec((tm, c3), lambda i: (i, 0)),
                       pl.BlockSpec((1, c3), lambda i: (0, 0)),
                       pl.BlockSpec((1, c3), lambda i: (0, 0))]),
        out_shape=(jax.ShapeDtypeStruct((mp, c3), jnp.float32),
                   jax.ShapeDtypeStruct((1, c3), jnp.float32),
                   jax.ShapeDtypeStruct((1, c3), jnp.float32)),
        compiler_params=_mosaic(("arbitrary",)),
    )(z2, scale2, shift2, w3_2d)


# ----------------- final: BN3 + deferred shortcut BN + residual add + ReLU -----------

def _residual_out_kernel(z3_ref, zsc_ref, s3_ref, ssc_ref, sh_ref, o_ref):
    y = z3_ref[...] * s3_ref[...] + zsc_ref[...] * ssc_ref[...] + sh_ref[...]
    o_ref[...] = jnp.maximum(y, 0.0)


def residual_out(z3, zsc, scale3, scale_sc, shift_total, *, tm):
    mp, c = z3.shape
    grid = (mp // tm,)
    return pl.pallas_call(
        _residual_out_kernel,
        grid_spec=pltpu.PrefetchScalarGridSpec(
            num_scalar_prefetch=0, grid=grid,
            in_specs=[pl.BlockSpec((tm, c), lambda i: (i, 0)),
                      pl.BlockSpec((tm, c), lambda i: (i, 0)),
                      pl.BlockSpec((1, c), lambda i: (0, 0)),
                      pl.BlockSpec((1, c), lambda i: (0, 0)),
                      pl.BlockSpec((1, c), lambda i: (0, 0))],
            out_specs=pl.BlockSpec((tm, c), lambda i: (i, 0))),
        out_shape=jax.ShapeDtypeStruct((mp, c), jnp.float32),
        compiler_params=_mosaic(("parallel",)),
    )(z3, zsc, scale3, scale_sc, shift_total)


# ----------------------------- forward (glue in plain JAX) ---------------------------

def conv_block_forward(x_nchw, params, f, s):
    n, cin, _, _ = x_nchw.shape
    F1 = params["w1"].shape[0]
    F2 = params["w2"].shape[0]
    F3 = params["w3"].shape[0]

    # fused NCHW->NHWC transpose + stride-s sampling (1x1 conv stride s, pad 0)
    xs = jnp.transpose(x_nchw[:, :, ::s, ::s], (0, 2, 3, 1))   # (N, Hs, Ws, Cin)
    _, hs, ws, _ = xs.shape
    m1 = n * hs * ws
    tm = _pick_tm(m1, max(cin, F1 + F3, F2, F3))
    xs2 = xs.reshape(m1, cin)

    # --- stage A: fused [w1 | w_sc] 1x1 stride-s conv, split outputs + BN stats
    w1_2d = params["w1"].reshape(F1, cin).T
    wsc_2d = params["w_sc"].reshape(F3, cin).T
    wcat = jnp.concatenate([w1_2d, wsc_2d], axis=1)            # (Cin, F1+F3)
    z1, zsc, sA, qA = matmul_stats_split(xs2, wcat, F1, tm=tm)
    gcat = jnp.concatenate([params["g1"], params["g_sc"]])
    bcat = jnp.concatenate([params["b1"], params["b_sc"]])
    scaleA, shiftA = _bn_scale_shift(sA, qA, gcat, bcat, m1)
    scale1, scale_sc = scaleA[:, :F1], scaleA[:, F1:]
    shift1, shift_sc = shiftA[:, :F1], shiftA[:, F1:]

    # --- stage A apply (main path only; shortcut BN deferred to the final kernel)
    y1_full = scale_shift_relu(z1, scale1, shift1, tm=tm)
    y1 = y1_full[:m1].reshape(n, hs, ws, F1)
    # TODO(synk): write y1 directly into the spatially padded layout from the
    #             apply kernel to remove this JAX reshape/pad copy.

    # --- stage B: fxf conv (stride 1, pad 1) + BN stats
    z2, s2, q2, m2, (_, ho, wo) = conv_fxf_stats(y1, params["w2"], f, tm=tm)
    assert (ho, wo) == (hs, ws), "residual add requires f == 3 with padding=1"
    scale2, shift2 = _bn_scale_shift(s2, q2, params["g2"], params["b2"], m2)
    m2p = _round_up(m2, tm)
    if m2p != m2:
        z2 = jnp.pad(z2, ((0, m2p - m2), (0, 0)))

    # --- fused stage-B BN apply + ReLU + stage-C 1x1 conv + BN stats
    w3_2d = params["w3"].reshape(F3, F2).T
    z3, s3, q3 = bn_relu_matmul_stats(z2, scale2, shift2, w3_2d,
                                      valid_rows=m2, tm=tm)
    scale3, shift3 = _bn_scale_shift(s3, q3, params["g3"], params["b3"], m2)

    # --- final: BN3 + deferred shortcut BN + residual add + ReLU
    out = residual_out(z3, zsc, scale3, scale_sc, shift3 + shift_sc, tm=tm)
    out = out[:m2].reshape(n, ho, wo, F3)
    return jnp.transpose(out, (0, 3, 1, 2))                    # back to NCHW


# ----------------------------- pure-JAX reference ------------------------------------

def _bn_train_ref(x, gamma, beta):
    mean = x.mean(axis=(0, 2, 3), keepdims=True)
    var = ((x - mean) ** 2).mean(axis=(0, 2, 3), keepdims=True)
    return (x - mean) * jax.lax.rsqrt(var + EPS) * gamma.reshape(1, -1, 1, 1) \
        + beta.reshape(1, -1, 1, 1)


def conv_block_reference(x, params, f, s):
    dn = ("NCHW", "OIHW", "NCHW")
    conv = lambda a, w, st, pad: jax.lax.conv_general_dilated(
        a, w, (st, st), pad, dimension_numbers=dn)
    sc = _bn_train_ref(conv(x, params["w_sc"], s, "VALID"),
                       params["g_sc"], params["b_sc"])
    y = jax.nn.relu(_bn_train_ref(conv(x, params["w1"], s, "VALID"),
                                  params["g1"], params["b1"]))
    y = jax.nn.relu(_bn_train_ref(conv(y, params["w2"], 1, [(1, 1), (1, 1)]),
                                  params["g2"], params["b2"]))
    y = _bn_train_ref(conv(y, params["w3"], 1, "VALID"),
                      params["g3"], params["b3"])
    return jax.nn.relu(y + sc)


# --------------------------------------- main ----------------------------------------

if __name__ == "__main__":
    in_channel, f, filters, s = 4, 3, (4, 4, 8), 2
    F1, F2, F3 = filters
    N, H, W = 2, 16, 16

    key = jax.random.PRNGKey(0)
    keys = jax.random.split(key, 13)
    params = {
        "w1":   0.2 * jax.random.normal(keys[0], (F1, in_channel, 1, 1), jnp.float32),
        "w2":   0.2 * jax.random.normal(keys[1], (F2, F1, f, f), jnp.float32),
        "w3":   0.2 * jax.random.normal(keys[2], (F3, F2, 1, 1), jnp.float32),
        "w_sc": 0.2 * jax.random.normal(keys[3], (F3, in_channel, 1, 1), jnp.float32),
        "g1": 1.0 + 0.1 * jax.random.normal(keys[4], (F1,), jnp.float32),
        "b1": 0.1 * jax.random.normal(keys[5], (F1,), jnp.float32),
        "g2": 1.0 + 0.1 * jax.random.normal(keys[6], (F2,), jnp.float32),
        "b2": 0.1 * jax.random.normal(keys[7], (F2,), jnp.float32),
        "g3": 1.0 + 0.1 * jax.random.normal(keys[8], (F3,), jnp.float32),
        "b3": 0.1 * jax.random.normal(keys[9], (F3,), jnp.float32),
        "g_sc": 1.0 + 0.1 * jax.random.normal(keys[10], (F3,), jnp.float32),
        "b_sc": 0.1 * jax.random.normal(keys[11], (F3,), jnp.float32),
    }
    x = jax.random.normal(keys[12], (N, in_channel, H, W), jnp.float32)

    out = jax.block_until_ready(conv_block_forward(x, params, f, s))
    ref = jax.block_until_ready(conv_block_reference(x, params, f, s))
    np.testing.assert_allclose(np.asarray(out), np.asarray(ref),
                               rtol=1e-4, atol=1e-4)
    print("KERNEL_OK")
</pallas_src>

<mosaic_0001>
module attributes {stable_mosaic.version = 11 : i64} {
  func.func @_mm_stats_split_kernel(%arg0: i32, %arg1: memref<128x4xf32, #tpu.memory_space<vmem>>, %arg2: memref<4x12xf32, #tpu.memory_space<vmem>>, %arg3: memref<128x4xf32, #tpu.memory_space<vmem>>, %arg4: memref<128x8xf32, #tpu.memory_space<vmem>>, %arg5: memref<1x12xf32, #tpu.memory_space<vmem>>, %arg6: memref<1x12xf32, #tpu.memory_space<vmem>>) attributes {dimension_semantics = [#tpu.dimension_semantics<arbitrary>], iteration_bounds = array<i64: 1>, scalar_prefetch = 0 : i64, scratch_operands = 0 : i64, tpu.core_type = #tpu.core_type<tc>, window_params = [{transform_indices = @transform_0, window_bounds = array<i64: 128, 4>}, {pipeline_mode = #tpu.pipeline_mode<synchronous>, transform_indices = @transform_1, window_bounds = array<i64: 4, 12>}, {transform_indices = @transform_2, window_bounds = array<i64: 128, 4>}, {transform_indices = @transform_3, window_bounds = array<i64: 128, 8>}, {pipeline_mode = #tpu.pipeline_mode<synchronous>, transform_indices = @transform_4, window_bounds = array<i64: 1, 12>}, {pipeline_mode = #tpu.pipeline_mode<synchronous>, transform_indices = @transform_5, window_bounds = array<i64: 1, 12>}]} {
    %c0 = arith.constant 0 : index
    %c0_0 = arith.constant 0 : index
    %0 = vector.load %arg1[%c0, %c0_0] : memref<128x4xf32, #tpu.memory_space<vmem>>, vector<128x4xf32>
    %c0_1 = arith.constant 0 : index
    %c0_2 = arith.constant 0 : index
    %1 = vector.load %arg2[%c0_1, %c0_2] : memref<4x12xf32, #tpu.memory_space<vmem>>, vector<4x12xf32>
    %cst = arith.constant dense<0.000000e+00> : vector<128x12xf32>
    %2 = tpu.matmul %0, %1, %cst {dimension_numbers = #tpu.dot_dimension_numbers<[1], [0], [0], [1], [0, 0, 1, 1], [], []>} : vector<128x4xf32>, vector<4x12xf32>, vector<128x12xf32> -> vector<128x12xf32>
    %3 = vector.extract_strided_slice %2 {offsets = [0, 0], sizes = [128, 4], strides = [1, 1]} : vector<128x12xf32> to vector<128x4xf32>
    %c0_3 = arith.constant 0 : index
    %c0_4 = arith.constant 0 : index
    %4 = vector.load %arg3[%c0_3, %c0_4] : memref<128x4xf32, #tpu.memory_space<vmem>>, vector<128x4xf32>
    tpu.vector_store %arg3[%c0_3, %c0_4], %3 {strides = array<i32>} : memref<128x4xf32, #tpu.memory_space<vmem>>, vector<128x4xf32>,
    %5 = vector.extract_strided_slice %2 {offsets = [0, 4], sizes = [128, 8], strides = [1, 1]} : vector<128x12xf32> to vector<128x8xf32>
    %c0_5 = arith.constant 0 : index
    %c0_6 = arith.constant 0 : index
    %6 = vector.load %arg4[%c0_5, %c0_6] : memref<128x8xf32, #tpu.memory_space<vmem>>, vector<128x8xf32>
    tpu.vector_store %arg4[%c0_5, %c0_6], %5 {strides = array<i32>} : memref<128x8xf32, #tpu.memory_space<vmem>>, vector<128x8xf32>,
    %c0_i32 = arith.constant 0 : i32
    %7 = arith.cmpi eq, %arg0, %c0_i32 : i32
    %8 = arith.extui %7 : i1 to i32
    %c0_i32_7 = arith.constant 0 : i32
    %9 = arith.cmpi ne, %8, %c0_i32_7 : i32
    scf.if %9 {
      %cst_18 = arith.constant 0.000000e+00 : f32
      %21 = vector.broadcast %cst_18 : f32 to vector<1x12xf32>
      %c0_19 = arith.constant 0 : index
      %c0_20 = arith.constant 0 : index
      %22 = vector.load %arg5[%c0_19, %c0_20] : memref<1x12xf32, #tpu.memory_space<vmem>>, vector<1x12xf32>
      tpu.vector_store %arg5[%c0_19, %c0_20], %21 {strides = array<i32>} : memref<1x12xf32, #tpu.memory_space<vmem>>, vector<1x12xf32>,
      %cst_21 = arith.constant 0.000000e+00 : f32
      %23 = vector.broadcast %cst_21 : f32 to vector<1x12xf32>
      %c0_22 = arith.constant 0 : index
      %c0_23 = arith.constant 0 : index
      %24 = vector.load %arg6[%c0_22, %c0_23] : memref<1x12xf32, #tpu.memory_space<vmem>>, vector<1x12xf32>
      tpu.vector_store %arg6[%c0_22, %c0_23], %23 {strides = array<i32>} : memref<1x12xf32, #tpu.memory_space<vmem>>, vector<1x12xf32>,
    } else {
    }
    %c0_8 = arith.constant 0 : index
    %c0_9 = arith.constant 0 : index
    %10 = vector.load %arg5[%c0_8, %c0_9] : memref<1x12xf32, #tpu.memory_space<vmem>>, vector<1x12xf32>
    %cst_10 = arith.constant dense<0.000000e+00> : vector<12xf32>
    %11 = vector.multi_reduction <add>, %2, %cst_10 [0] : vector<128x12xf32> to vector<12xf32>
    %12 = vector.shape_cast %11 : vector<12xf32> to vector<1x12xf32>
    %13 = arith.addf %10, %12 : vector<1x12xf32>
    %c0_11 = arith.constant 0 : index
    %c0_12 = arith.constant 0 : index
    %14 = vector.load %arg5[%c0_11, %c0_12] : memref<1x12xf32, #tpu.memory_space<vmem>>, vector<1x12xf32>
    tpu.vector_store %arg5[%c0_11, %c0_12], %13 {strides = array<i32>} : memref<1x12xf32, #tpu.memory_space<vmem>>, vector<1x12xf32>,
    %c0_13 = arith.constant 0 : index
    %c0_14 = arith.constant 0 : index
    %15 = vector.load %arg6[%c0_13, %c0_14] : memref<1x12xf32, #tpu.memory_space<vmem>>, vector<1x12xf32>
    %16 = arith.mulf %2, %2 : vector<128x12xf32>
    %cst_15 = arith.constant dense<0.000000e+00> : vector<12xf32>
    %17 = vector.multi_reduction <add>, %16, %cst_15 [0] : vector<128x12xf32> to vector<12xf32>
    %18 = vector.shape_cast %17 : vector<12xf32> to vector<1x12xf32>
    %19 = arith.addf %15, %18 : vector<1x12xf32>
    %c0_16 = arith.constant 0 : index
    %c0_17 = arith.constant 0 : index
    %20 = vector.load %arg6[%c0_16, %c0_17] : memref<1x12xf32, #tpu.memory_space<vmem>>, vector<1x12xf32>
    tpu.vector_store %arg6[%c0_16, %c0_17], %19 {strides = array<i32>} : memref<1x12xf32, #tpu.memory_space<vmem>>, vector<1x12xf32>,
    return
  }
  func.func @transform_0(%arg0: i32) -> (i32, i32) {
    %c0_i32 = arith.constant 0 : i32
    %c0_i32_0 = arith.constant 0 : i32
    return %arg0, %c0_i32 : i32, i32
  }
  func.func @transform_1(%arg0: i32) -> (i32, i32) {
    %c0_i32 = arith.constant 0 : i32
    %c0_i32_0 = arith.constant 0 : i32
    %c0_i32_1 = arith.constant 0 : i32
    return %c0_i32, %c0_i32_0 : i32, i32
  }
  func.func @transform_2(%arg0: i32) -> (i32, i32) {
    %c0_i32 = arith.constant 0 : i32
    %c0_i32_0 = arith.constant 0 : i32
    return %arg0, %c0_i32 : i32, i32
  }
  func.func @transform_3(%arg0: i32) -> (i32, i32) {
    %c0_i32 = arith.constant 0 : i32
    %c0_i32_0 = arith.constant 0 : i32
    return %arg0, %c0_i32 : i32, i32
  }
  func.func @transform_4(%arg0: i32) -> (i32, i32) {
    %c0_i32 = arith.constant 0 : i32
    %c0_i32_0 = arith.constant 0 : i32
    %c0_i32_1 = arith.constant 0 : i32
    return %c0_i32, %c0_i32_0 : i32, i32
  }
  func.func @transform_5(%arg0: i32) -> (i32, i32) {
    %c0_i32 = arith.constant 0 : i32
    %c0_i32_0 = arith.constant 0 : i32
    %c0_i32_1 = arith.constant 0 : i32
    return %c0_i32, %c0_i32_0 : i32, i32
  }
}

</mosaic_0001>

<bundles_post_ra>
// kernel: tpu_custom_call.1
= control target key start
LH: loop header
LB: loop body
LE: loop exit
PB: predicated region body
PF: predicated region fallthrough
CT: control target
= control target key end

     0   :  { %11 = vsyncpa [#allocation3], 0  ;;  %vm83_vm0 = vcmask 1043456   ;;  %vm34_vm1 = vcmask 31744   ;;  %s799_s0 = inlined_call_operand.vmem [shape: f32[128,4], index: 0, kind: input, shape index: {}]   ;;  %s800_s1 = inlined_call_operand.vmem [shape: f32[4,12], index: 1, kind: input, shape index: {}]   ;;  %s801_s2 = inlined_call_operand.vmem [shape: f32[128,4], index: 2, kind: output, shape index: {0}]   ;;  %s802_s3 = inlined_call_operand.vmem [shape: f32[128,8], index: 3, kind: output, shape index: {1}]   ;;  %s803_s4 = inlined_call_operand.hbm [shape: f32[1,12], index: 4, kind: output, shape index: {2}]   ;;  %s804_s5 = inlined_call_operand.hbm [shape: f32[1,12], index: 5, kind: output, shape index: {3}]  }
   0x1   :  { %v33_v0 = vld [vmem:[%s800_s1] sm:$0xf] }
   0x2   :  { %v17_v1 = vld [vmem:[%s799_s0] sm:$0xff]  ;;  %394 = vmatpush.msk.msra.mxu0 %vm83_vm0, %v33_v0  ;;  %411 = vmatpush.msk.msra.mxu1 %vm83_vm0, %v33_v0 }
   0x3   :  { %v21_v2 = vld [vmem:[%s799_s0 + $0x20] sm:$0xff]  ;;  %395 = vmatmul.msk.f32.vlgmr.msra.gmra.mxu0 %vm34_vm1, %v17_v1  ;;  %412 = vmatpush.msk.msra.mxu2 %vm83_vm0, %v33_v0 }
   0x4   :  { %v25_v3 = vld [vmem:[%s799_s0 + $0x40] sm:$0xff]  ;;  %399 = vmatmul.msk.f32.vlgmr.msra.gmra.mxu1 %vm34_vm1, %v21_v2  ;;  %413 = vmatpush.msk.msra.mxu3 %vm83_vm0, %v33_v0 }
   0x5   :  { %v29_v4 = vld [vmem:[%s799_s0 + $0x60] sm:$0xff]  ;;  %403 = vmatmul.msk.f32.vlgmr.msra.gmra.mxu2 %vm34_vm1, %v25_v3 }
   0x6   :  { %407 = vmatmul.msk.f32.vlgmr.msra.gmra.mxu3 %vm34_vm1, %v29_v4 }
   0x7   :  { %12 = vsyncpa [#allocation5], 0  ;;  %v18_v5 = vld [vmem:[%s799_s0 + $0x8] sm:$0xff]  ;;  %v19_v9 = vld [vmem:[%s799_s0 + $0x10] sm:$0xff]  ;;  %s470_s1 = smov 124   ;;  %vm257_vm2 = vcmask 97280  }
   0x8   :  { %v22_v6 = vld [vmem:[%s799_s0 + $0x28] sm:$0xff]  ;;  %v23_v10 = vld [vmem:[%s799_s0 + $0x30] sm:$0xff]  ;;  %v20_v13 = vld [vmem:[%s799_s0 + $0x18] sm:$0xff]  ;;  %vm253_vm3 = vcmask 90112   ;;  %v471_v60 = vmov 0.0   ;;  %s365_s9 = sshll.u32 %s803_s4, 4  ;;  %s366_s9 = int_to_ptr.hbm [resolvable:$true] %s365_s9 }
   0x9   :  { %v26_v7 = vld [vmem:[%s799_s0 + $0x48] sm:$0xff]  ;;  %v27_v11 = vld [vmem:[%s799_s0 + $0x50] sm:$0xff]  ;;  %v24_v14 = vld [vmem:[%s799_s0 + $0x38] sm:$0xff]  ;;  %254 = vst.msk [vmem:[#allocation2] sm:$0x1] %vm253_vm3, %v471_v60  ;;  %s376_s13 = sshll.u32 %s804_s5, 4  ;;  %s377_s13 = int_to_ptr.hbm [resolvable:$true] %s376_s13 }
   0xa   :  { %v30_v8 = vld [vmem:[%s799_s0 + $0x68] sm:$0xff]  ;;  %v31_v12 = vld [vmem:[%s799_s0 + $0x70] sm:$0xff]  ;;  %v28_v15 = vld [vmem:[%s799_s0 + $0x58] sm:$0xff]  ;;  %255 = vst.msk [vmem:[#allocation4] sm:$0x1] %vm253_vm3, %v471_v60  ;;  %vm232_vm4 = vcmask 64512  }
   0xb   :  { %396 = vmatmul.msk.f32.gmra.mxu0 %vm34_vm1, %v18_v5  ;;  %v32_v16 = vld [vmem:[%s799_s0 + $0x78] sm:$0xff] }
   0xc   :  { %400 = vmatmul.msk.f32.gmra.mxu1 %vm34_vm1, %v22_v6 }
   0xd   :  { %404 = vmatmul.msk.f32.gmra.mxu2 %vm34_vm1, %v26_v7 }
   0xe   :  { %408 = vmatmul.msk.f32.gmra.mxu3 %vm34_vm1, %v30_v8 }
  0x11   :  { %v298_v60 = vld [vmem:[#allocation4] sm:$0x1] }
  0x13   :  { %397 = vmatmul.msk.f32.gmra.mxu0 %vm34_vm1, %v19_v9 }
  0x14   :  { %401 = vmatmul.msk.f32.gmra.mxu1 %vm34_vm1, %v23_v10 }
  0x15   :  { %405 = vmatmul.msk.f32.gmra.mxu2 %vm34_vm1, %v27_v11 }
  0x16   :  { %409 = vmatmul.msk.f32.gmra.mxu3 %vm34_vm1, %v31_v12 }
  0x1b   :  { %398 = vmatmul.msk.f32.gmra.mxu0 %vm34_vm1, %v20_v13 }
  0x1c   :  { %402 = vmatmul.msk.f32.gmra.mxu1 %vm34_vm1, %v24_v14 }
  0x1d   :  { %406 = vmatmul.msk.f32.gmra.mxu2 %vm34_vm1, %v28_v15 }
  0x1e   :  { %410 = vmatmul.msk.f32.gmra.mxu3 %vm34_vm1, %v32_v16 }
  0x80   :  { %v104_v17 = vpop.f32.mrf.mxu0 }
  0x81   :  { %v116_v18 = vpop.f32.mrf.mxu1  ;;  %152 = vst.msk [vmem:[%s801_s2] sm:$0xff] %vm34_vm1, %v104_v17  ;;  %184 = vrot.lane.b32.xlu0 %v104_v17, %s470_s1  ;;  %v299_v28 = vmul.f32 %v104_v17, %v104_v17  ;;  %v258_v31 = vsel %vm257_vm2, %v104_v17, 0.0 }
  0x82   :  { %192 = vrot.lane.b32.xlu2 %v116_v18, %s470_s1  ;;  %156 = vst.msk [vmem:[%s801_s2 + $0x20] sm:$0xff] %vm34_vm1, %v116_v18  ;;  %v303_v37 = vmul.f32 %v116_v18, %v116_v18  ;;  %v265_v45 = vsel %vm257_vm2, %v116_v18, 0.0 }
  0x83   :  { %v315_v35 = vsel %vm257_vm2, %v299_v28, 0.0 }
  0x84   :  { %v322_v52 = vsel %vm257_vm2, %v303_v37, 0.0 }
  0x88   :  { %v107_v19 = vpop.f32.mrf.mxu0  ;;  %v581_v20 = vpop.f32.mrf.mxu2 }
  0x89   :  { %153 = vst.msk [vmem:[%s801_s2 + $0x8] sm:$0xff] %vm34_vm1, %v107_v19  ;;  %v587_v21 = vpop.f32.mrf.mxu3  ;;  %v119_v22 = vpop.f32.mrf.mxu1  ;;  %v300_v25 = vmul.f32 %v107_v19, %v107_v19  ;;  %v259_v29 = vsel %vm257_vm2, %v107_v19, 0.0  ;;  %v307_v3 = vmul.f32 %v581_v20, %v581_v20  ;;  %v273_v8 = vsel %vm257_vm2, %v581_v20, 0.0 }
  0x8a   :  { %200 = vrot.lane.b32.xlu2 %v581_v20, %s470_s1  ;;  %160 = vst.msk [vmem:[%s801_s2 + $0x40] sm:$0xff] %vm34_vm1, %v581_v20  ;;  %208 = vrot.lane.b32.xlu0 %v587_v21, %s470_s1  ;;  %v260_v34 = vadd.f32 %v259_v29, %v258_v31  ;;  %v304_v49 = vmul.f32 %v119_v22, %v119_v22  ;;  %v267_v55 = vsel %vm257_vm2, %v119_v22, 0.0 }
  0x8b   :  { %164 = vst.msk [vmem:[%s801_s2 + $0x60] sm:$0xff] %vm34_vm1, %v587_v21  ;;  %v316_v32 = vsel %vm257_vm2, %v300_v25, 0.0  ;;  %v330_v12 = vsel %vm257_vm2, %v307_v3, 0.0  ;;  %v311_v25 = vmul.f32 %v587_v21, %v587_v21 }
  0x8c   :  { %157 = vst.msk [vmem:[%s801_s2 + $0x28] sm:$0xff] %vm34_vm1, %v119_v22  ;;  %v317_v38 = vadd.f32 %v316_v32, %v315_v35  ;;  %v324_v61 = vsel %vm257_vm2, %v304_v49, 0.0 }
  0x90   :  { %v110_v23 = vpop.f32.mrf.mxu0  ;;  %v607_v24 = vpop.f32.mrf.mxu2 }
  0x91   :  { %154 = vst.msk [vmem:[%s801_s2 + $0x10] sm:$0xff] %vm34_vm1, %v110_v23  ;;  %188 = vrot.lane.b32.xlu1 %v110_v23, %s470_s1  ;;  %v614_v26 = vpop.f32.mrf.mxu1  ;;  %v617_v27 = vpop.f32.mrf.mxu3  ;;  %v301_v30 = vmul.f32 %v110_v23, %v110_v23  ;;  %v261_v33 = vsel %vm257_vm2, %v110_v23, 0.0  ;;  %v308_v9 = vmul.f32 %v607_v24, %v607_v24  ;;  %v275_v13 = vsel %vm257_vm2, %v607_v24, 0.0 }
  0x92   :  { %194 = vrot.lane.b32.xlu2 %v119_v22, %s470_s1  ;;  %161 = vst.msk [vmem:[%s801_s2 + $0x48] sm:$0xff] %vm34_vm1, %v607_v24  ;;  %186 = vrot.lane.b32.xlu0 %v107_v19, %s470_s1  ;;  %v262_v40 = vadd.f32 %v261_v33, %v260_v34  ;;  %v305_v51 = vmul.f32 %v614_v26, %v614_v26  ;;  %v269_v56 = vsel %vm257_vm2, %v614_v26, 0.0  ;;  %v338_v34 = vsel %vm257_vm2, %v311_v25, 0.0 }
  0x93   :  { %158 = vst.msk [vmem:[%s801_s2 + $0x30] sm:$0xff] %vm34_vm1, %v614_v26  ;;  %v318_v36 = vsel %vm257_vm2, %v301_v30, 0.0  ;;  %v332_v18 = vsel %vm257_vm2, %v308_v9, 0.0  ;;  %v281_v30 = vsel %vm257_vm2, %v587_v21, 0.0  ;;  %v312_v31 = vmul.f32 %v617_v27, %v617_v27 }
  0x94   :  { %165 = vst.msk [vmem:[%s801_s2 + $0x68] sm:$0xff] %vm34_vm1, %v617_v27  ;;  %v319_v47 = vadd.f32 %v318_v36, %v317_v38  ;;  %v326_v62 = vsel %vm257_vm2, %v305_v51, 0.0  ;;  %v283_v35 = vsel %vm257_vm2, %v617_v27, 0.0 }
  0x98   :  { %v113_v39 = vpop.f32.mrf.mxu0  ;;  %v134_v41 = vpop.f32.mrf.mxu2 }
  0x99   :  { %155 = vst.msk [vmem:[%s801_s2 + $0x18] sm:$0xff] %vm34_vm1, %v113_v39  ;;  %v263_v42 = vsel %vm257_vm2, %v113_v39, 0.0  ;;  %v302_v43 = vmul.f32 %v113_v39, %v113_v39  ;;  %204 = vrot.lane.b32.xlu1 %v134_v41, %s470_s1  ;;  %v647_v44 = vpop.f32.mrf.mxu3  ;;  %v125_v48 = vpop.f32.mrf.mxu1  ;;  %v309_v14 = vmul.f32 %v134_v41, %v134_v41  ;;  %v277_v19 = vsel %vm257_vm2, %v134_v41, 0.0 }
  0x9a   :  { %v264_v46 = vadd.f32 %v263_v42, %v262_v40  ;;  %162 = vst.msk [vmem:[%s801_s2 + $0x50] sm:$0xff] %vm34_vm1, %v134_v41  ;;  %202 = vrot.lane.b32.xlu0 %v607_v24, %s470_s1  ;;  %v306_v57 = vmul.f32 %v125_v48, %v125_v48  ;;  %v271_v63 = vsel %vm257_vm2, %v125_v48, 0.0  ;;  %v313_v36 = vmul.f32 %v647_v44, %v647_v44 }
  0x9b   :  { %v320_v50 = vsel %vm257_vm2, %v302_v43, 0.0  ;;  %159 = vst.msk [vmem:[%s801_s2 + $0x38] sm:$0xff] %vm34_vm1, %v125_v48  ;;  %v340_v40 = vsel %vm257_vm2, %v312_v31, 0.0  ;;  %v285_v21 = vsel %vm257_vm2, %v647_v44, 0.0 }
  0x9c   :  { %v266_v53 = vadd.f32 %v265_v45, %v264_v46  ;;  %v321_v54 = vadd.f32 %v320_v50, %v319_v47  ;;  %166 = vst.msk [vmem:[%s801_s2 + $0x70] sm:$0xff] %vm34_vm1, %v647_v44  ;;  %v328_v4 = vsel %vm257_vm2, %v306_v57, 0.0  ;;  %v342_v45 = vsel %vm257_vm2, %v313_v36, 0.0 }
  0x9e   :  { %v323_v58 = vadd.f32 %v322_v52, %v321_v54  ;;  %v268_v59 = vadd.f32 %v267_v55, %v266_v53 }
  0xa0   :  { %v270_v0 = vadd.f32 %v269_v56, %v268_v59  ;;  %v325_v1 = vadd.f32 %v324_v61, %v323_v58  ;;  %v137_v2 = vpop.f32.mrf.mxu2  ;;  %v256_v58 = vld [vmem:[#allocation2] sm:$0x1] }
  0xa1   :  { %163 = vst.msk [vmem:[%s801_s2 + $0x58] sm:$0xff] %vm34_vm1, %v137_v2  ;;  %206 = vrot.lane.b32.xlu2 %v137_v2, %s470_s1  ;;  %190 = vrot.lane.b32.xlu1 %v113_v39, %s470_s1  ;;  %v149_v5 = vpop.f32.mrf.mxu3  ;;  %v310_v15 = vmul.f32 %v137_v2, %v137_v2  ;;  %v279_v20 = vsel %vm257_vm2, %v137_v2, 0.0 }
  0xa2   :  { %v272_v6 = vadd.f32 %v271_v63, %v270_v0  ;;  %v327_v7 = vadd.f32 %v326_v62, %v325_v1  ;;  %196 = vrot.lane.b32.xlu0 %v614_v26, %s470_s1  ;;  %167 = vst.msk [vmem:[%s801_s2 + $0x78] sm:$0xff] %vm34_vm1, %v149_v5  ;;  %v334_v26 = vsel %vm257_vm2, %v309_v14, 0.0  ;;  %v314_v37 = vmul.f32 %v149_v5, %v149_v5  ;;  %s472_s2 = smov [#allocation2]  }
  0xa3   :  { %v336_v28 = vsel %vm257_vm2, %v310_v15, 0.0  ;;  %v287_v41 = vsel %vm257_vm2, %v149_v5, 0.0  ;;  %s363_s6 = sshll.u32 %s472_s2, 4  ;;  %s364_s6 = int_to_ptr.vmem [resolvable:$true] %s363_s6 }
  0xa4   :  { %v274_v10 = vadd.f32 %v273_v8, %v272_v6  ;;  %v329_v11 = vadd.f32 %v328_v4, %v327_v7  ;;  %v344_v46 = vsel %vm257_vm2, %v314_v37, 0.0 }
  0xa6   :  { %v331_v16 = vadd.f32 %v330_v12, %v329_v11  ;;  %v276_v17 = vadd.f32 %v275_v13, %v274_v10 }
  0xa8   :  { %v278_v22 = vadd.f32 %v277_v19, %v276_v17  ;;  %v333_v23 = vadd.f32 %v332_v18, %v331_v16 }
  0xa9   :  { %212 = vrot.lane.b32.xlu2 %v647_v44, %s470_s1  ;;  %198 = vrot.lane.b32.xlu1 %v125_v48, %s470_s1 }
  0xaa   :  { %v280_v24 = vadd.f32 %v279_v20, %v278_v22  ;;  %v335_v29 = vadd.f32 %v334_v26, %v333_v23  ;;  %214 = vrot.lane.b32.xlu0 %v149_v5, %s470_s1 }
  0xac   :  { %v282_v32 = vadd.f32 %v281_v30, %v280_v24  ;;  %v337_v33 = vadd.f32 %v336_v28, %v335_v29 }
  0xae   :  { %v339_v38 = vadd.f32 %v338_v34, %v337_v33  ;;  %v284_v39 = vadd.f32 %v283_v35, %v282_v32 }
  0xb0   :  { %v341_v42 = vadd.f32 %v340_v40, %v339_v38  ;;  %v286_v43 = vadd.f32 %v285_v21, %v284_v39 }
  0xb1   :  { %210 = vrot.lane.b32.xlu1 %v617_v27, %s470_s1  ;;  %s473_s1 = smov [#allocation4]  }
  0xb2   :  { %v288_v47 = vadd.f32 %v287_v41, %v286_v43  ;;  %v343_v48 = vadd.f32 %v342_v45, %v341_v42  ;;  %s374_s10 = sshll.u32 %s473_s1, 4  ;;  %s375_s10 = int_to_ptr.vmem [resolvable:$true] %s374_s10 }
  0xb4   :  { %v289_v49 = vrot.slane %v288_v47, 4  ;;  %v345_v50 = vadd.f32 %v344_v46, %v343_v48 }
  0xb6   :  { %v290_v51 = vadd.f32 %v289_v49, %v288_v47  ;;  %v346_v52 = vrot.slane %v345_v50, 4 }
  0xb8   :  { %v291_v53 = vrot.slane %v290_v51, 2  ;;  %v347_v54 = vadd.f32 %v346_v52, %v345_v50 }
  0xba   :  { %v292_v44 = vadd.f32 %v291_v53, %v290_v51  ;;  %v348_v55 = vrot.slane %v347_v54, 2 }
  0xbc   :  { %v293_v56 = vrot.slane %v292_v44, 1  ;;  %v349_v57 = vadd.f32 %v348_v55, %v347_v54 }
  0xbe   :  { %v294_v27 = vadd.f32 %v293_v56, %v292_v44  ;;  %v350_v59 = vrot.slane %v349_v57, 1 }
  0xc0   :  { %v295_v61 = vadd.f32 %v294_v27, %v256_v58  ;;  %v351_v62 = vadd.f32 %v350_v59, %v349_v57 }
  0xc2   :  { %297 = vst.msk [vmem:[#allocation2] sm:$0x1] %vm253_vm3, %v295_v61  ;;  %v352_v63 = vadd.f32 %v351_v62, %v298_v60 }
  0xc3   :  { %368 = dma.vmem_to_hbm [thread:$0]  %s364_s6, 16, %s366_s9, [#allocation3]  }
  0xc4   :  { %353 = vst.msk [vmem:[#allocation4] sm:$0x1] %vm253_vm3, %v352_v63 }
  0xc5   :  { %379 = dma.vmem_to_hbm [thread:$0]  %s375_s10, 16, %s377_s13, [#allocation5]  }
  0xdc   :  { %v193_v0 = vpop.permute.xlu2 %192 }
  0xdd   :  { %237 = vst.msk [vmem:[%s802_s3 + $0x20] sm:$0xff] %vm232_vm4, %v193_v0 }
  0xe4   :  { %v201_v1 = vpop.permute.xlu2 %200 }
  0xe5   :  { %241 = vst.msk [vmem:[%s802_s3 + $0x40] sm:$0xff] %vm232_vm4, %v201_v1 }
  0xec   :  { %v195_v2 = vpop.permute.xlu2 %194 }
  0xed   :  { %238 = vst.msk [vmem:[%s802_s3 + $0x28] sm:$0xff] %vm232_vm4, %v195_v2 }
  0xf3   :  { %v185_v3 = vpop.permute.xlu0 %184 }
  0xf4   :  { %233 = vst.msk [vmem:[%s802_s3] sm:$0xff] %vm232_vm4, %v185_v3 }
  0xfb   :  { %v207_v4 = vpop.permute.xlu2 %206 }
  0xfc   :  { %244 = vst.msk [vmem:[%s802_s3 + $0x58] sm:$0xff] %vm232_vm4, %v207_v4  ;;  %v209_v5 = vpop.permute.xlu0 %208 }
  0xfd   :  { %245 = vst.msk [vmem:[%s802_s3 + $0x60] sm:$0xff] %vm232_vm4, %v209_v5 }
 0x103   :  { %v213_v6 = vpop.permute.xlu2 %212  ;;  %v189_v7 = vpop.permute.xlu1 %188 }
 0x104   :  { %247 = vst.msk [vmem:[%s802_s3 + $0x70] sm:$0xff] %vm232_vm4, %v213_v6  ;;  %v187_v8 = vpop.permute.xlu0 %186 }
 0x105   :  { %234 = vst.msk [vmem:[%s802_s3 + $0x8] sm:$0xff] %vm232_vm4, %v187_v8 }
 0x106   :  { %235 = vst.msk [vmem:[%s802_s3 + $0x10] sm:$0xff] %vm232_vm4, %v189_v7 }
 0x10b   :  { %v205_v9 = vpop.permute.xlu1 %204 }
 0x10c   :  { %v203_v10 = vpop.permute.xlu0 %202  ;;  %243 = vst.msk [vmem:[%s802_s3 + $0x50] sm:$0xff] %vm232_vm4, %v205_v9 }
 0x10d   :  { %242 = vst.msk [vmem:[%s802_s3 + $0x48] sm:$0xff] %vm232_vm4, %v203_v10 }
 0x113   :  { %v191_v11 = vpop.permute.xlu1 %190 }
 0x114   :  { %v197_v12 = vpop.permute.xlu0 %196  ;;  %236 = vst.msk [vmem:[%s802_s3 + $0x18] sm:$0xff] %vm232_vm4, %v191_v11 }
 0x115   :  { %239 = vst.msk [vmem:[%s802_s3 + $0x30] sm:$0xff] %vm232_vm4, %v197_v12 }
 0x11b   :  { %v199_v13 = vpop.permute.xlu1 %198 }
 0x11c   :  { %240 = vst.msk [vmem:[%s802_s3 + $0x38] sm:$0xff] %vm232_vm4, %v199_v13  ;;  %v215_v14 = vpop.permute.xlu0 %214 }
 0x11d   :  { %248 = vst.msk [vmem:[%s802_s3 + $0x78] sm:$0xff] %vm232_vm4, %v215_v14 }
 0x123   :  { %v211_v15 = vpop.permute.xlu1 %210 }
 0x124   :  { %246 = vst.msk [vmem:[%s802_s3 + $0x68] sm:$0xff] %vm232_vm4, %v211_v15 }
 0x125   :  { %466 = dma.done.wait [#allocation3], 16  }
 0x126   :  { %467 = vsyncadd [#allocation3], 4294967280 }
 0x127   :  { %468 = dma.done.wait [#allocation5], 16  }
 0x128   :  { %469 = vsyncadd [#allocation5], 4294967280 }
 0x129   :  { %392 = vsyncpa [#allocation3], 1 }
 0x12a   :  { %393 = vsyncpa [#allocation5], 1 }

</bundles_post_ra>
